<compile_context>
chip_gen: v7x
topology: tpu7x:2x2x1
jax: 0.10.0
libtpu: 0.0.40
codegen_flags: <defaults>
</compile_context>

<pallas_src>
from functools import partial

import jax
import jax.numpy as jnp
from jax.experimental import pallas as pl
from jax.experimental.pallas import tpu as pltpu


def lstm_fc_kernel(x_ref, wx_ref, wh_ref, b_ref, wfc_ref, bfc_ref, out_ref,
                   *, T, Bp):
    """x_ref: (T*Bp, D) time-major flattened; out_ref: (T*Bp, Ap)."""
    H = wh_ref.shape[0]

    # ---- 1) Hoisted input projection for all timesteps, kept in vregs ----
    #    (T*Bp, D) @ (D, 4H) + (1, 4H)  ->  (T*Bp, 4H)   (64 x 128 f32 here)
    xw = (jnp.dot(x_ref[...], wx_ref[...], preferred_element_type=jnp.float32)
          + b_ref[...])

    # Hoisted weight / bias loads (outside the serial loop).
    wh = wh_ref[...]        # (H, 4H)
    wfc = wfc_ref[...]      # (H, Ap)
    bfc = bfc_ref[...]      # (1, Ap)

    h = jnp.zeros((Bp, H), jnp.float32)
    c = jnp.zeros((Bp, H), jnp.float32)

    # ---- 2) Statically unrolled recurrence, FC fused per step ----
    for t in range(T):                       # T is a Python int -> static offsets
        gates = xw[t * Bp:(t + 1) * Bp, :] + jnp.dot(
            h, wh, preferred_element_type=jnp.float32)      # (Bp, 4H)
        sig = jax.nn.sigmoid(gates)          # one full-vreg EUP push
        i_g = sig[:, 0 * H:1 * H]
        f_g = sig[:, 1 * H:2 * H]
        o_g = sig[:, 3 * H:4 * H]
        g_g = jnp.tanh(gates[:, 2 * H:3 * H])
        c = f_g * c + i_g * g_g
        h = o_g * jnp.tanh(c)
        # Fused FC + single lane-dense (Bp x Ap = 8 x 128) unmasked store.
        out_ref[t * Bp:(t + 1) * Bp, :] = (
            jnp.dot(h, wfc, preferred_element_type=jnp.float32) + bfc)


def imitation_lstm_forward(x, w_ih, w_hh, b_ih, b_hh, w_fc, b_fc):
    """x: (B, T, D). Weights in PyTorch layout: w_ih (4H, D), w_hh (4H, H),
    b_ih/b_hh (4H,), w_fc (A, H), b_fc (A,). Returns (B, T, A) float32."""
    B, T, D = x.shape
    H = w_hh.shape[1]
    A = w_fc.shape[0]

    SUB, LANE = 8, 128                               # f32 sublane / lane widths
    Bp = max(SUB, ((B + SUB - 1) // SUB) * SUB)      # pad batch to sublane group
    Ap = max(LANE, ((A + LANE - 1) // LANE) * LANE)  # lane-dense FC output

    # Layout work in the wrapper (free XLA metadata ops, not in-kernel copies):
    x = jnp.asarray(x, jnp.float32)
    x_tm = jnp.swapaxes(x, 0, 1)                             # (T, B, D)
    x_tm = jnp.pad(x_tm, ((0, 0), (0, Bp - B), (0, 0)))      # (T, Bp, D)
    x_flat = x_tm.reshape(T * Bp, D)                         # (T*Bp, D)

    wx = jnp.asarray(w_ih, jnp.float32).T                    # (D, 4H)
    wh = jnp.asarray(w_hh, jnp.float32).T                    # (H, 4H)
    b = (jnp.asarray(b_ih, jnp.float32)
         + jnp.asarray(b_hh, jnp.float32))[None, :]          # (1, 4H)
    wfc = jnp.zeros((H, Ap), jnp.float32).at[:, :A].set(
        jnp.asarray(w_fc, jnp.float32).T)                    # (H, Ap)
    bfc = jnp.zeros((1, Ap), jnp.float32).at[:, :A].set(
        jnp.asarray(b_fc, jnp.float32)[None, :])             # (1, Ap)

    vmem = pl.BlockSpec(memory_space=pltpu.MemorySpace.VMEM)
    out_flat = pl.pallas_call(
        partial(lstm_fc_kernel, T=T, Bp=Bp),
        out_shape=jax.ShapeDtypeStruct((T * Bp, Ap), jnp.float32),
        in_specs=[vmem] * 6,
        out_specs=vmem,
    )(x_flat, wx, wh, b, wfc, bfc)

    # (T*Bp, Ap) -> (T, Bp, Ap) -> batch-first, drop batch / lane padding.
    out_tm = out_flat.reshape(T, Bp, Ap)
    return jnp.swapaxes(out_tm, 0, 1)[:B, :, :A]


def lstm_fc_reference(x, w_ih, w_hh, b_ih, b_hh, w_fc, b_fc):
    B, T, D = x.shape
    H = w_hh.shape[1]

    def step(carry, xt):
        h, c = carry
        gates = xt @ w_ih.T + b_ih + h @ w_hh.T + b_hh
        i, f, g, o = jnp.split(gates, 4, axis=-1)
        i = jax.nn.sigmoid(i)
        f = jax.nn.sigmoid(f)
        g = jnp.tanh(g)
        o = jax.nn.sigmoid(o)
        c = f * c + i * g
        h = o * jnp.tanh(c)
        return (h, c), h

    h0 = jnp.zeros((B, H), jnp.float32)
    c0 = jnp.zeros((B, H), jnp.float32)
    _, hs = jax.lax.scan(step, (h0, c0), jnp.swapaxes(x, 0, 1))
    out = jnp.swapaxes(hs, 0, 1)                              # (B, T, H)
    return out @ w_fc.T + b_fc


if __name__ == "__main__":
    # Small shapes consistent with the module: input_dim=9, hidden=32, actions=8
    B, T, D, H, A = 2, 8, 9, 32, 8

    key = jax.random.PRNGKey(0)
    ks = jax.random.split(key, 8)
    k_scale = 1.0 / jnp.sqrt(H)  # PyTorch default uniform(-1/sqrt(H), 1/sqrt(H))

    w_ih = jax.random.uniform(ks[0], (4 * H, D), jnp.float32, -k_scale, k_scale)
    w_hh = jax.random.uniform(ks[1], (4 * H, H), jnp.float32, -k_scale, k_scale)
    b_ih = jax.random.uniform(ks[2], (4 * H,), jnp.float32, -k_scale, k_scale)
    b_hh = jax.random.uniform(ks[3], (4 * H,), jnp.float32, -k_scale, k_scale)
    w_fc = jax.random.uniform(ks[4], (A, H), jnp.float32, -k_scale, k_scale)
    b_fc = jax.random.uniform(ks[5], (A,), jnp.float32, -k_scale, k_scale)
    x = jax.random.normal(ks[6], (B, T, D), jnp.float32)

    out = imitation_lstm_forward(x, w_ih, w_hh, b_ih, b_hh, w_fc, b_fc)
    out = jax.block_until_ready(out)

    ref = jax.block_until_ready(
        lstm_fc_reference(x, w_ih, w_hh, b_ih, b_hh, w_fc, b_fc))

    assert out.shape == (B, T, A), out.shape
    assert jnp.allclose(out, ref, atol=1e-3, rtol=1e-3), (
        float(jnp.max(jnp.abs(out - ref))))

    print("KERNEL_OK")
</pallas_src>

<mosaic_0001>
module attributes {stable_mosaic.version = 11 : i64} {
  func.func @lstm_fc_kernel(%arg0: memref<64x9xf32, #tpu.memory_space<vmem>>, %arg1: memref<9x128xf32, #tpu.memory_space<vmem>>, %arg2: memref<32x128xf32, #tpu.memory_space<vmem>>, %arg3: memref<1x128xf32, #tpu.memory_space<vmem>>, %arg4: memref<32x128xf32, #tpu.memory_space<vmem>>, %arg5: memref<1x128xf32, #tpu.memory_space<vmem>>, %arg6: memref<64x128xf32, #tpu.memory_space<vmem>>) attributes {dimension_semantics = [], scalar_prefetch = 0 : i64, scratch_operands = 0 : i64, tpu.core_type = #tpu.core_type<tc>} {
    %c0 = arith.constant 0 : index
    %c0_0 = arith.constant 0 : index
    %0 = vector.load %arg0[%c0, %c0_0] : memref<64x9xf32, #tpu.memory_space<vmem>>, vector<64x9xf32>
    %c0_1 = arith.constant 0 : index
    %c0_2 = arith.constant 0 : index
    %1 = vector.load %arg1[%c0_1, %c0_2] : memref<9x128xf32, #tpu.memory_space<vmem>>, vector<9x128xf32>
    %cst = arith.constant dense<0.000000e+00> : vector<64x128xf32>
    %2 = tpu.matmul %0, %1, %cst {dimension_numbers = #tpu.dot_dimension_numbers<[1], [0], [0], [1], [0, 0, 1, 1], [], []>} : vector<64x9xf32>, vector<9x128xf32>, vector<64x128xf32> -> vector<64x128xf32>
    %c0_3 = arith.constant 0 : index
    %c0_4 = arith.constant 0 : index
    %3 = vector.load %arg3[%c0_3, %c0_4] : memref<1x128xf32, #tpu.memory_space<vmem>>, vector<1x128xf32>
    %4 = vector.broadcast %3 : vector<1x128xf32> to vector<64x128xf32>
    %5 = arith.addf %2, %4 : vector<64x128xf32>
    %c0_5 = arith.constant 0 : index
    %c0_6 = arith.constant 0 : index
    %6 = vector.load %arg2[%c0_5, %c0_6] : memref<32x128xf32, #tpu.memory_space<vmem>>, vector<32x128xf32>
    %c0_7 = arith.constant 0 : index
    %c0_8 = arith.constant 0 : index
    %7 = vector.load %arg4[%c0_7, %c0_8] : memref<32x128xf32, #tpu.memory_space<vmem>>, vector<32x128xf32>
    %c0_9 = arith.constant 0 : index
    %c0_10 = arith.constant 0 : index
    %8 = vector.load %arg5[%c0_9, %c0_10] : memref<1x128xf32, #tpu.memory_space<vmem>>, vector<1x128xf32>
    %cst_11 = arith.constant 0.000000e+00 : f32
    %9 = vector.broadcast %cst_11 : f32 to vector<8x32xf32>
    %cst_12 = arith.constant 0.000000e+00 : f32
    %10 = vector.broadcast %cst_12 : f32 to vector<8x32xf32>
    %11 = vector.extract_strided_slice %5 {offsets = [0, 0], sizes = [8, 128], strides = [1, 1]} : vector<64x128xf32> to vector<8x128xf32>
    %cst_13 = arith.constant dense<0.000000e+00> : vector<8x128xf32>
    %12 = tpu.matmul %9, %6, %cst_13 {dimension_numbers = #tpu.dot_dimension_numbers<[1], [0], [0], [1], [0, 0, 1, 1], [], []>} : vector<8x32xf32>, vector<32x128xf32>, vector<8x128xf32> -> vector<8x128xf32>
    %13 = arith.addf %11, %12 : vector<8x128xf32>
    %14 = arith.negf %13 : vector<8x128xf32>
    %15 = math.exp %14 : vector<8x128xf32>
    %cst_14 = arith.constant 1.000000e+00 : f32
    %16 = vector.broadcast %cst_14 : f32 to vector<8x128xf32>
    %17 = arith.addf %16, %15 : vector<8x128xf32>
    %18 = arith.divf %16, %17 : vector<8x128xf32>
    %19 = vector.extract_strided_slice %18 {offsets = [0, 0], sizes = [8, 32], strides = [1, 1]} : vector<8x128xf32> to vector<8x32xf32>
    %20 = vector.extract_strided_slice %18 {offsets = [0, 32], sizes = [8, 32], strides = [1, 1]} : vector<8x128xf32> to vector<8x32xf32>
    %21 = vector.extract_strided_slice %18 {offsets = [0, 96], sizes = [8, 32], strides = [1, 1]} : vector<8x128xf32> to vector<8x32xf32>
    %22 = vector.extract_strided_slice %13 {offsets = [0, 64], sizes = [8, 32], strides = [1, 1]} : vector<8x128xf32> to vector<8x32xf32>
    %23 = math.tanh %22 : vector<8x32xf32>
    %24 = arith.mulf %20, %10 : vector<8x32xf32>
    %25 = arith.mulf %19, %23 : vector<8x32xf32>
    %26 = arith.addf %24, %25 : vector<8x32xf32>
    %27 = math.tanh %26 : vector<8x32xf32>
    %28 = arith.mulf %21, %27 : vector<8x32xf32>
    %cst_15 = arith.constant dense<0.000000e+00> : vector<8x128xf32>
    %29 = tpu.matmul %28, %7, %cst_15 {dimension_numbers = #tpu.dot_dimension_numbers<[1], [0], [0], [1], [0, 0, 1, 1], [], []>} : vector<8x32xf32>, vector<32x128xf32>, vector<8x128xf32> -> vector<8x128xf32>
    %30 = vector.broadcast %8 : vector<1x128xf32> to vector<8x128xf32>
    %31 = arith.addf %29, %30 : vector<8x128xf32>
    %c0_16 = arith.constant 0 : index
    %c0_17 = arith.constant 0 : index
    %32 = vector.load %arg6[%c0_16, %c0_17] : memref<64x128xf32, #tpu.memory_space<vmem>>, vector<8x128xf32>
    tpu.vector_store %arg6[%c0_16, %c0_17], %31 {strides = array<i32>} : memref<64x128xf32, #tpu.memory_space<vmem>>, vector<8x128xf32>,
    %33 = vector.extract_strided_slice %5 {offsets = [8, 0], sizes = [8, 128], strides = [1, 1]} : vector<64x128xf32> to vector<8x128xf32>
    %cst_18 = arith.constant dense<0.000000e+00> : vector<8x128xf32>
    %34 = tpu.matmul %28, %6, %cst_18 {dimension_numbers = #tpu.dot_dimension_numbers<[1], [0], [0], [1], [0, 0, 1, 1], [], []>} : vector<8x32xf32>, vector<32x128xf32>, vector<8x128xf32> -> vector<8x128xf32>
    %35 = arith.addf %33, %34 : vector<8x128xf32>
    %36 = arith.negf %35 : vector<8x128xf32>
    %37 = math.exp %36 : vector<8x128xf32>
    %cst_19 = arith.constant 1.000000e+00 : f32
    %38 = vector.broadcast %cst_19 : f32 to vector<8x128xf32>
    %39 = arith.addf %38, %37 : vector<8x128xf32>
    %40 = arith.divf %38, %39 : vector<8x128xf32>
    %41 = vector.extract_strided_slice %40 {offsets = [0, 0], sizes = [8, 32], strides = [1, 1]} : vector<8x128xf32> to vector<8x32xf32>
    %42 = vector.extract_strided_slice %40 {offsets = [0, 32], sizes = [8, 32], strides = [1, 1]} : vector<8x128xf32> to vector<8x32xf32>
    %43 = vector.extract_strided_slice %40 {offsets = [0, 96], sizes = [8, 32], strides = [1, 1]} : vector<8x128xf32> to vector<8x32xf32>
    %44 = vector.extract_strided_slice %35 {offsets = [0, 64], sizes = [8, 32], strides = [1, 1]} : vector<8x128xf32> to vector<8x32xf32>
    %45 = math.tanh %44 : vector<8x32xf32>
    %46 = arith.mulf %42, %26 : vector<8x32xf32>
    %47 = arith.mulf %41, %45 : vector<8x32xf32>
    %48 = arith.addf %46, %47 : vector<8x32xf32>
    %49 = math.tanh %48 : vector<8x32xf32>
    %50 = arith.mulf %43, %49 : vector<8x32xf32>
    %cst_20 = arith.constant dense<0.000000e+00> : vector<8x128xf32>
    %51 = tpu.matmul %50, %7, %cst_20 {dimension_numbers = #tpu.dot_dimension_numbers<[1], [0], [0], [1], [0, 0, 1, 1], [], []>} : vector<8x32xf32>, vector<32x128xf32>, vector<8x128xf32> -> vector<8x128xf32>
    %52 = vector.broadcast %8 : vector<1x128xf32> to vector<8x128xf32>
    %53 = arith.addf %51, %52 : vector<8x128xf32>
    %c8 = arith.constant 8 : index
    %c0_21 = arith.constant 0 : index
    %54 = vector.load %arg6[%c8, %c0_21] : memref<64x128xf32, #tpu.memory_space<vmem>>, vector<8x128xf32>
    tpu.vector_store %arg6[%c8, %c0_21], %53 {strides = array<i32>} : memref<64x128xf32, #tpu.memory_space<vmem>>, vector<8x128xf32>,
    %55 = vector.extract_strided_slice %5 {offsets = [16, 0], sizes = [8, 128], strides = [1, 1]} : vector<64x128xf32> to vector<8x128xf32>
    %cst_22 = arith.constant dense<0.000000e+00> : vector<8x128xf32>
    %56 = tpu.matmul %50, %6, %cst_22 {dimension_numbers = #tpu.dot_dimension_numbers<[1], [0], [0], [1], [0, 0, 1, 1], [], []>} : vector<8x32xf32>, vector<32x128xf32>, vector<8x128xf32> -> vector<8x128xf32>
    %57 = arith.addf %55, %56 : vector<8x128xf32>
    %58 = arith.negf %57 : vector<8x128xf32>
    %59 = math.exp %58 : vector<8x128xf32>
    %cst_23 = arith.constant 1.000000e+00 : f32
    %60 = vector.broadcast %cst_23 : f32 to vector<8x128xf32>
    %61 = arith.addf %60, %59 : vector<8x128xf32>
    %62 = arith.divf %60, %61 : vector<8x128xf32>
    %63 = vector.extract_strided_slice %62 {offsets = [0, 0], sizes = [8, 32], strides = [1, 1]} : vector<8x128xf32> to vector<8x32xf32>
    %64 = vector.extract_strided_slice %62 {offsets = [0, 32], sizes = [8, 32], strides = [1, 1]} : vector<8x128xf32> to vector<8x32xf32>
    %65 = vector.extract_strided_slice %62 {offsets = [0, 96], sizes = [8, 32], strides = [1, 1]} : vector<8x128xf32> to vector<8x32xf32>
    %66 = vector.extract_strided_slice %57 {offsets = [0, 64], sizes = [8, 32], strides = [1, 1]} : vector<8x128xf32> to vector<8x32xf32>
    %67 = math.tanh %66 : vector<8x32xf32>
    %68 = arith.mulf %64, %48 : vector<8x32xf32>
    %69 = arith.mulf %63, %67 : vector<8x32xf32>
    %70 = arith.addf %68, %69 : vector<8x32xf32>
    %71 = math.tanh %70 : vector<8x32xf32>
    %72 = arith.mulf %65, %71 : vector<8x32xf32>
    %cst_24 = arith.constant dense<0.000000e+00> : vector<8x128xf32>
    %73 = tpu.matmul %72, %7, %cst_24 {dimension_numbers = #tpu.dot_dimension_numbers<[1], [0], [0], [1], [0, 0, 1, 1], [], []>} : vector<8x32xf32>, vector<32x128xf32>, vector<8x128xf32> -> vector<8x128xf32>
    %74 = vector.broadcast %8 : vector<1x128xf32> to vector<8x128xf32>
    %75 = arith.addf %73, %74 : vector<8x128xf32>
    %c16 = arith.constant 16 : index
    %c0_25 = arith.constant 0 : index
    %76 = vector.load %arg6[%c16, %c0_25] : memref<64x128xf32, #tpu.memory_space<vmem>>, vector<8x128xf32>
    tpu.vector_store %arg6[%c16, %c0_25], %75 {strides = array<i32>} : memref<64x128xf32, #tpu.memory_space<vmem>>, vector<8x128xf32>,
    %77 = vector.extract_strided_slice %5 {offsets = [24, 0], sizes = [8, 128], strides = [1, 1]} : vector<64x128xf32> to vector<8x128xf32>
    %cst_26 = arith.constant dense<0.000000e+00> : vector<8x128xf32>
    %78 = tpu.matmul %72, %6, %cst_26 {dimension_numbers = #tpu.dot_dimension_numbers<[1], [0], [0], [1], [0, 0, 1, 1], [], []>} : vector<8x32xf32>, vector<32x128xf32>, vector<8x128xf32> -> vector<8x128xf32>
    %79 = arith.addf %77, %78 : vector<8x128xf32>
    %80 = arith.negf %79 : vector<8x128xf32>
    %81 = math.exp %80 : vector<8x128xf32>
    %cst_27 = arith.constant 1.000000e+00 : f32
    %82 = vector.broadcast %cst_27 : f32 to vector<8x128xf32>
    %83 = arith.addf %82, %81 : vector<8x128xf32>
    %84 = arith.divf %82, %83 : vector<8x128xf32>
    %85 = vector.extract_strided_slice %84 {offsets = [0, 0], sizes = [8, 32], strides = [1, 1]} : vector<8x128xf32> to vector<8x32xf32>
    %86 = vector.extract_strided_slice %84 {offsets = [0, 32], sizes = [8, 32], strides = [1, 1]} : vector<8x128xf32> to vector<8x32xf32>
    %87 = vector.extract_strided_slice %84 {offsets = [0, 96], sizes = [8, 32], strides = [1, 1]} : vector<8x128xf32> to vector<8x32xf32>
    %88 = vector.extract_strided_slice %79 {offsets = [0, 64], sizes = [8, 32], strides = [1, 1]} : vector<8x128xf32> to vector<8x32xf32>
    %89 = math.tanh %88 : vector<8x32xf32>
    %90 = arith.mulf %86, %70 : vector<8x32xf32>
    %91 = arith.mulf %85, %89 : vector<8x32xf32>
    %92 = arith.addf %90, %91 : vector<8x32xf32>
    %93 = math.tanh %92 : vector<8x32xf32>
    %94 = arith.mulf %87, %93 : vector<8x32xf32>
    %cst_28 = arith.constant dense<0.000000e+00> : vector<8x128xf32>
    %95 = tpu.matmul %94, %7, %cst_28 {dimension_numbers = #tpu.dot_dimension_numbers<[1], [0], [0], [1], [0, 0, 1, 1], [], []>} : vector<8x32xf32>, vector<32x128xf32>, vector<8x128xf32> -> vector<8x128xf32>
    %96 = vector.broadcast %8 : vector<1x128xf32> to vector<8x128xf32>
    %97 = arith.addf %95, %96 : vector<8x128xf32>
    %c24 = arith.constant 24 : index
    %c0_29 = arith.constant 0 : index
    %98 = vector.load %arg6[%c24, %c0_29] : memref<64x128xf32, #tpu.memory_space<vmem>>, vector<8x128xf32>
    tpu.vector_store %arg6[%c24, %c0_29], %97 {strides = array<i32>} : memref<64x128xf32, #tpu.memory_space<vmem>>, vector<8x128xf32>,
    %99 = vector.extract_strided_slice %5 {offsets = [32, 0], sizes = [8, 128], strides = [1, 1]} : vector<64x128xf32> to vector<8x128xf32>
    %cst_30 = arith.constant dense<0.000000e+00> : vector<8x128xf32>
    %100 = tpu.matmul %94, %6, %cst_30 {dimension_numbers = #tpu.dot_dimension_numbers<[1], [0], [0], [1], [0, 0, 1, 1], [], []>} : vector<8x32xf32>, vector<32x128xf32>, vector<8x128xf32> -> vector<8x128xf32>
    %101 = arith.addf %99, %100 : vector<8x128xf32>
    %102 = arith.negf %101 : vector<8x128xf32>
    %103 = math.exp %102 : vector<8x128xf32>
    %cst_31 = arith.constant 1.000000e+00 : f32
    %104 = vector.broadcast %cst_31 : f32 to vector<8x128xf32>
    %105 = arith.addf %104, %103 : vector<8x128xf32>
    %106 = arith.divf %104, %105 : vector<8x128xf32>
    %107 = vector.extract_strided_slice %106 {offsets = [0, 0], sizes = [8, 32], strides = [1, 1]} : vector<8x128xf32> to vector<8x32xf32>
    %108 = vector.extract_strided_slice %106 {offsets = [0, 32], sizes = [8, 32], strides = [1, 1]} : vector<8x128xf32> to vector<8x32xf32>
    %109 = vector.extract_strided_slice %106 {offsets = [0, 96], sizes = [8, 32], strides = [1, 1]} : vector<8x128xf32> to vector<8x32xf32>
    %110 = vector.extract_strided_slice %101 {offsets = [0, 64], sizes = [8, 32], strides = [1, 1]} : vector<8x128xf32> to vector<8x32xf32>
    %111 = math.tanh %110 : vector<8x32xf32>
    %112 = arith.mulf %108, %92 : vector<8x32xf32>
    %113 = arith.mulf %107, %111 : vector<8x32xf32>
    %114 = arith.addf %112, %113 : vector<8x32xf32>
    %115 = math.tanh %114 : vector<8x32xf32>
    %116 = arith.mulf %109, %115 : vector<8x32xf32>
    %cst_32 = arith.constant dense<0.000000e+00> : vector<8x128xf32>
    %117 = tpu.matmul %116, %7, %cst_32 {dimension_numbers = #tpu.dot_dimension_numbers<[1], [0], [0], [1], [0, 0, 1, 1], [], []>} : vector<8x32xf32>, vector<32x128xf32>, vector<8x128xf32> -> vector<8x128xf32>
    %118 = vector.broadcast %8 : vector<1x128xf32> to vector<8x128xf32>
    %119 = arith.addf %117, %118 : vector<8x128xf32>
    %c32 = arith.constant 32 : index
    %c0_33 = arith.constant 0 : index
    %120 = vector.load %arg6[%c32, %c0_33] : memref<64x128xf32, #tpu.memory_space<vmem>>, vector<8x128xf32>
    tpu.vector_store %arg6[%c32, %c0_33], %119 {strides = array<i32>} : memref<64x128xf32, #tpu.memory_space<vmem>>, vector<8x128xf32>,
    %121 = vector.extract_strided_slice %5 {offsets = [40, 0], sizes = [8, 128], strides = [1, 1]} : vector<64x128xf32> to vector<8x128xf32>
    %cst_34 = arith.constant dense<0.000000e+00> : vector<8x128xf32>
    %122 = tpu.matmul %116, %6, %cst_34 {dimension_numbers = #tpu.dot_dimension_numbers<[1], [0], [0], [1], [0, 0, 1, 1], [], []>} : vector<8x32xf32>, vector<32x128xf32>, vector<8x128xf32> -> vector<8x128xf32>
    %123 = arith.addf %121, %122 : vector<8x128xf32>
    %124 = arith.negf %123 : vector<8x128xf32>
    %125 = math.exp %124 : vector<8x128xf32>
    %cst_35 = arith.constant 1.000000e+00 : f32
    %126 = vector.broadcast %cst_35 : f32 to vector<8x128xf32>
    %127 = arith.addf %126, %125 : vector<8x128xf32>
    %128 = arith.divf %126, %127 : vector<8x128xf32>
    %129 = vector.extract_strided_slice %128 {offsets = [0, 0], sizes = [8, 32], strides = [1, 1]} : vector<8x128xf32> to vector<8x32xf32>
    %130 = vector.extract_strided_slice %128 {offsets = [0, 32], sizes = [8, 32], strides = [1, 1]} : vector<8x128xf32> to vector<8x32xf32>
    %131 = vector.extract_strided_slice %128 {offsets = [0, 96], sizes = [8, 32], strides = [1, 1]} : vector<8x128xf32> to vector<8x32xf32>
    %132 = vector.extract_strided_slice %123 {offsets = [0, 64], sizes = [8, 32], strides = [1, 1]} : vector<8x128xf32> to vector<8x32xf32>
    %133 = math.tanh %132 : vector<8x32xf32>
    %134 = arith.mulf %130, %114 : vector<8x32xf32>
    %135 = arith.mulf %129, %133 : vector<8x32xf32>
    %136 = arith.addf %134, %135 : vector<8x32xf32>
    %137 = math.tanh %136 : vector<8x32xf32>
    %138 = arith.mulf %131, %137 : vector<8x32xf32>
    %cst_36 = arith.constant dense<0.000000e+00> : vector<8x128xf32>
    %139 = tpu.matmul %138, %7, %cst_36 {dimension_numbers = #tpu.dot_dimension_numbers<[1], [0], [0], [1], [0, 0, 1, 1], [], []>} : vector<8x32xf32>, vector<32x128xf32>, vector<8x128xf32> -> vector<8x128xf32>
    %140 = vector.broadcast %8 : vector<1x128xf32> to vector<8x128xf32>
    %141 = arith.addf %139, %140 : vector<8x128xf32>
    %c40 = arith.constant 40 : index
    %c0_37 = arith.constant 0 : index
    %142 = vector.load %arg6[%c40, %c0_37] : memref<64x128xf32, #tpu.memory_space<vmem>>, vector<8x128xf32>
    tpu.vector_store %arg6[%c40, %c0_37], %141 {strides = array<i32>} : memref<64x128xf32, #tpu.memory_space<vmem>>, vector<8x128xf32>,
    %143 = vector.extract_strided_slice %5 {offsets = [48, 0], sizes = [8, 128], strides = [1, 1]} : vector<64x128xf32> to vector<8x128xf32>
    %cst_38 = arith.constant dense<0.000000e+00> : vector<8x128xf32>
    %144 = tpu.matmul %138, %6, %cst_38 {dimension_numbers = #tpu.dot_dimension_numbers<[1], [0], [0], [1], [0, 0, 1, 1], [], []>} : vector<8x32xf32>, vector<32x128xf32>, vector<8x128xf32> -> vector<8x128xf32>
    %145 = arith.addf %143, %144 : vector<8x128xf32>
    %146 = arith.negf %145 : vector<8x128xf32>
    %147 = math.exp %146 : vector<8x128xf32>
    %cst_39 = arith.constant 1.000000e+00 : f32
    %148 = vector.broadcast %cst_39 : f32 to vector<8x128xf32>
    %149 = arith.addf %148, %147 : vector<8x128xf32>
    %150 = arith.divf %148, %149 : vector<8x128xf32>
    %151 = vector.extract_strided_slice %150 {offsets = [0, 0], sizes = [8, 32], strides = [1, 1]} : vector<8x128xf32> to vector<8x32xf32>
    %152 = vector.extract_strided_slice %150 {offsets = [0, 32], sizes = [8, 32], strides = [1, 1]} : vector<8x128xf32> to vector<8x32xf32>
    %153 = vector.extract_strided_slice %150 {offsets = [0, 96], sizes = [8, 32], strides = [1, 1]} : vector<8x128xf32> to vector<8x32xf32>
    %154 = vector.extract_strided_slice %145 {offsets = [0, 64], sizes = [8, 32], strides = [1, 1]} : vector<8x128xf32> to vector<8x32xf32>
    %155 = math.tanh %154 : vector<8x32xf32>
    %156 = arith.mulf %152, %136 : vector<8x32xf32>
    %157 = arith.mulf %151, %155 : vector<8x32xf32>
    %158 = arith.addf %156, %157 : vector<8x32xf32>
    %159 = math.tanh %158 : vector<8x32xf32>
    %160 = arith.mulf %153, %159 : vector<8x32xf32>
    %cst_40 = arith.constant dense<0.000000e+00> : vector<8x128xf32>
    %161 = tpu.matmul %160, %7, %cst_40 {dimension_numbers = #tpu.dot_dimension_numbers<[1], [0], [0], [1], [0, 0, 1, 1], [], []>} : vector<8x32xf32>, vector<32x128xf32>, vector<8x128xf32> -> vector<8x128xf32>
    %162 = vector.broadcast %8 : vector<1x128xf32> to vector<8x128xf32>
    %163 = arith.addf %161, %162 : vector<8x128xf32>
    %c48 = arith.constant 48 : index
    %c0_41 = arith.constant 0 : index
    %164 = vector.load %arg6[%c48, %c0_41] : memref<64x128xf32, #tpu.memory_space<vmem>>, vector<8x128xf32>
    tpu.vector_store %arg6[%c48, %c0_41], %163 {strides = array<i32>} : memref<64x128xf32, #tpu.memory_space<vmem>>, vector<8x128xf32>,
    %165 = vector.extract_strided_slice %5 {offsets = [56, 0], sizes = [8, 128], strides = [1, 1]} : vector<64x128xf32> to vector<8x128xf32>
    %cst_42 = arith.constant dense<0.000000e+00> : vector<8x128xf32>
    %166 = tpu.matmul %160, %6, %cst_42 {dimension_numbers = #tpu.dot_dimension_numbers<[1], [0], [0], [1], [0, 0, 1, 1], [], []>} : vector<8x32xf32>, vector<32x128xf32>, vector<8x128xf32> -> vector<8x128xf32>
    %167 = arith.addf %165, %166 : vector<8x128xf32>
    %168 = arith.negf %167 : vector<8x128xf32>
    %169 = math.exp %168 : vector<8x128xf32>
    %cst_43 = arith.constant 1.000000e+00 : f32
    %170 = vector.broadcast %cst_43 : f32 to vector<8x128xf32>
    %171 = arith.addf %170, %169 : vector<8x128xf32>
    %172 = arith.divf %170, %171 : vector<8x128xf32>
    %173 = vector.extract_strided_slice %172 {offsets = [0, 0], sizes = [8, 32], strides = [1, 1]} : vector<8x128xf32> to vector<8x32xf32>
    %174 = vector.extract_strided_slice %172 {offsets = [0, 32], sizes = [8, 32], strides = [1, 1]} : vector<8x128xf32> to vector<8x32xf32>
    %175 = vector.extract_strided_slice %172 {offsets = [0, 96], sizes = [8, 32], strides = [1, 1]} : vector<8x128xf32> to vector<8x32xf32>
    %176 = vector.extract_strided_slice %167 {offsets = [0, 64], sizes = [8, 32], strides = [1, 1]} : vector<8x128xf32> to vector<8x32xf32>
    %177 = math.tanh %176 : vector<8x32xf32>
    %178 = arith.mulf %174, %158 : vector<8x32xf32>
    %179 = arith.mulf %173, %177 : vector<8x32xf32>
    %180 = arith.addf %178, %179 : vector<8x32xf32>
    %181 = math.tanh %180 : vector<8x32xf32>
    %182 = arith.mulf %175, %181 : vector<8x32xf32>
    %cst_44 = arith.constant dense<0.000000e+00> : vector<8x128xf32>
    %183 = tpu.matmul %182, %7, %cst_44 {dimension_numbers = #tpu.dot_dimension_numbers<[1], [0], [0], [1], [0, 0, 1, 1], [], []>} : vector<8x32xf32>, vector<32x128xf32>, vector<8x128xf32> -> vector<8x128xf32>
    %184 = vector.broadcast %8 : vector<1x128xf32> to vector<8x128xf32>
    %185 = arith.addf %183, %184 : vector<8x128xf32>
    %c56 = arith.constant 56 : index
    %c0_45 = arith.constant 0 : index
    %186 = vector.load %arg6[%c56, %c0_45] : memref<64x128xf32, #tpu.memory_space<vmem>>, vector<8x128xf32>
    tpu.vector_store %arg6[%c56, %c0_45], %185 {strides = array<i32>} : memref<64x128xf32, #tpu.memory_space<vmem>>, vector<8x128xf32>,
    return
  }
}

</mosaic_0001>

<bundles_post_ra>
// kernel: tpu_custom_call.1
= control target key start
LH: loop header
LB: loop body
LE: loop exit
PB: predicated region body
PF: predicated region fallthrough
CT: control target
= control target key end

     0   :  { %vm66_vm0 = vcmask 1040384   ;;  %v2093_v2 = vmov 0.0|0.0   ;;  %vm2094_vm1 = vmmov 1   ;;  %vm41_vm3 = vcmask 72704   ;;  %s2411_s0 = inlined_call_operand.vmem [shape: f32[64,9], index: 0, kind: input, shape index: {}]   ;;  %s2412_s1 = inlined_call_operand.vmem [shape: f32[9,128], index: 1, kind: input, shape index: {}]   ;;  %s2413_s2 = inlined_call_operand.vmem [shape: f32[32,128], index: 2, kind: input, shape index: {}]   ;;  %s2414_s3 = inlined_call_operand.vmem [shape: f32[1,128], index: 3, kind: input, shape index: {}]   ;;  %s2415_s4 = inlined_call_operand.vmem [shape: f32[32,128], index: 4, kind: input, shape index: {}]   ;;  %s2416_s5 = inlined_call_operand.vmem [shape: f32[1,128], index: 5, kind: input, shape index: {}]   ;;  %s2417_s6 = inlined_call_operand.hbm [shape: f32[64,128], index: 6, kind: output, shape index: {}]  }
   0x1   :  { %v32_v0 = vld [vmem:[%s2412_s1] sm:$0xff]  ;;  %v33_v1 = vld [vmem:[%s2412_s1 + $0x8] sm:$0x1]  ;;  %1900 = vmatprep.subr.bf16.mxu1 %v2093_v2  ;;  %vm1895_vm2 = vmpackc.low %vm66_vm0, %vm2094_vm1  ;;  %vm2095_vm4 = vmmov 0   ;;  %v2096_v9 = vmov 0.0  }
   0x2   :  { %v1894_v3 = vpack.c.bf16 %v33_v1, %v32_v0  ;;  %v175_v4 = vld [vmem:[%s2413_s2] sm:$0xff]  ;;  %v176_v5 = vld [vmem:[%s2413_s2 + $0x8] sm:$0xff]  ;;  %v177_v8 = vld [vmem:[%s2413_s2 + $0x10] sm:$0xff]  ;;  %1726 = vmatprep.mubr.msk.f32.mxu1 %vm2095_vm4, %v2096_v9 }
   0x3   :  { %v2150_v6 = vpack.c.bf16 %v176_v5, %v175_v4  ;;  %v24_v7 = vld [vmem:[%s2411_s0] sm:$0xff]  ;;  %v178_v10 = vld [vmem:[%s2413_s2 + $0x18] sm:$0xff] }
   0x4   :  { %1896 = vmatprep.subr.msk.bf16.mxu0 %vm1895_vm2, %v1894_v3  ;;  %1706 = vmatprep.mubr.msk.f32.mxu0 %vm41_vm3, %v24_v7 }
   0x5   :  { %11 = vsyncpa [#allocation3], 0  ;;  %1902 = vmatpush3.bf16.msra.mxu1 %v2150_v6  ;;  %1899 = vmatpush3.bf16.msk.msra.mxu0 %vm1895_vm2, %v1894_v3  ;;  %v25_v11 = vld [vmem:[%s2411_s0 + $0x8] sm:$0xff]  ;;  %v2168_v12 = vpack.c.bf16 %v178_v10, %v177_v8  ;;  %v2185_v13 = vld [vmem:[%s2414_s3] ss:$0 sm:$0xff]  ;;  %s2097_s13 = smov 64  }
   0x6   :  { %1903 = vmatprep.subr.bf16.mxu1 %v2093_v2  ;;  %1912 = vmatprep.subr.bf16.mxu0 %v2093_v2  ;;  %s2098_s3 = smov 32   ;;  %v26_v30 = vld [vmem:[%s2411_s0 + $0x10] sm:$0xff]  ;;  %v27_v31 = vld [vmem:[%s2411_s0 + $0x18] sm:$0xff]  ;;  %v28_v32 = vld [vmem:[%s2411_s0 + $0x20] sm:$0xff]  ;;  %vm184_vm5 = vcmask 261120  }
   0x7   :  { %v179_v33 = vld [vmem:[%s2415_s4] sm:$0xff]  ;;  %v180_v34 = vld [vmem:[%s2415_s4 + $0x8] sm:$0xff]  ;;  %v181_v36 = vld [vmem:[%s2415_s4 + $0x10] sm:$0xff] }
   0x8   :  { %1707 = vmatmul.mubr.msk.f32.vlgmr.msra.gmra.mrb[0].mxu0 %vm41_vm3, %v25_v11  ;;  %v2212_v35 = vpack.c.bf16 %v180_v34, %v179_v33  ;;  %v29_v37 = vld [vmem:[%s2411_s0 + $0x28] sm:$0xff]  ;;  %v182_v38 = vld [vmem:[%s2415_s4 + $0x18] sm:$0xff]  ;;  %v30_v39 = vld [vmem:[%s2411_s0 + $0x30] sm:$0xff] }
   0x9   :  { %1905 = vmatpush3.bf16.msra.mxu1 %v2168_v12  ;;  %1914 = vmatpush3.bf16.msra.mxu0 %v2150_v6  ;;  %v2228_v40 = vpack.c.bf16 %v182_v38, %v181_v36  ;;  %v31_v41 = vld [vmem:[%s2411_s0 + $0x38] sm:$0xff]  ;;  %v2270_v52 = vld [vmem:[%s2416_s5] ss:$0 sm:$0xff]  ;;  %s2099_s5 = smov [#allocation2]  }
   0xa   :  { %1915 = vmatprep.subr.bf16.mxu0 %v2093_v2  ;;  %1906 = vmatprep.subr.bf16.mxu1 %v2093_v2  ;;  %s1567_s9 = sshll.u32 %s2099_s5, 4  ;;  %s1568_s9 = int_to_ptr.vmem [resolvable:$true] %s1567_s9 }
   0xb   :  { %1709 = vmatprep.mubr.msk.f32.mxu0 %vm41_vm3, %v26_v30  ;;  %s2069_s10 = scalar_lea.vmem %s1568_s9, 1024  ;;  %p2074_p1 = scmp.lt.s32.totalorder %s1568_s9, %s1568_s9 }
   0xc   :  { %1727 = vmatmul.mubr.f32.vlgmr.msra.gmra.mrb[0].mxu1 %v2096_v9  ;;  %1710 = vmatmul.mubr.msk.f32.gmra.mrb[2].mxu0 %vm41_vm3, %v27_v31  ;;  %p2070_p0 = scmp.ne.s32.totalorder %s1568_s9, %s2069_s10  ;;  %p2075_p2 = scmp.lt.s32.totalorder %s2069_s10, %s2069_s10 }
   0xd   :  { %1917 = vmatpush3.bf16.msra.mxu0 %v2168_v12  ;;  %1737 = vmatprep.mubr.msk.f32.mxu1 %vm2095_vm4, %v2096_v9 }
   0xe   :  { %1924 = vmatprep.subr.bf16.mxu0 %v2093_v2  ;;  %1712 = vmatprep.mubr.msk.f32.mxu0 %vm41_vm3, %v28_v32  ;;  %p2076_p3 = por %p2075_p2, %p2074_p1 }
   0xf   :  { %1908 = vmatpush3.bf16.msra.mxu1 %v2212_v35 }
  0x10   :  { %1909 = vmatprep.subr.bf16.mxu1 %v2093_v2  ;;  %1713 = vmatmul.mubr.msk.f32.gmra.mrb[4].mxu0 %vm41_vm3, %v29_v37  ;;  %p2077_p4 = pnand %p2076_p3, %p2070_p0 }
  0x11   :  { %1715 = vmatprep.mubr.msk.f32.mxu0 %vm41_vm3, %v30_v39 }
  0x13   :  { %1911 = vmatpush3.bf16.msra.mxu1 %v2228_v40 }
  0x14   :  { %1918 = vmatprep.subr.bf16.mxu1 %v2093_v2  ;;  %1716 = vmatmul.mubr.msk.f32.gmra.mrb[6].mxu0 %vm41_vm3, %v31_v41 }
  0x15   :  { %1748 = vmatprep.mubr.msk.f32.mxu0 %vm2095_vm4, %v2096_v9 }
  0xdb   :  { %v2187_v14 = vpop.f32.mrb[0].mxu0 }
  0xdc   :  { %v136_v15 = vpop.f32.mrb[1].mxu0  ;;  %v142_v53 = vadd.f32 %v2187_v14, %v2185_v13 }
  0xdd   :  { %v137_v16 = vadd.f32 %v2185_v13, %v136_v15 }
  0xdf   :  { %v254_v17 = vpop.f32.mrb[0].mxu1  ;;  %v2243_v45 = vpop.f32.mrb[2].mxu0 }
  0xe0   :  { %v258_v18 = vadd.f32 %v254_v17, %v137_v16  ;;  %v1728_v19 = vpop.f32.mrb[1].mxu1  ;;  %v146_v46 = vpop.f32.mrb[3].mxu0  ;;  %v152_v37 = vadd.f32 %v2243_v45, %v2185_v13 }
  0xe1   :  { %v147_v15 = vadd.f32 %v2185_v13, %v146_v46 }
  0xe2   :  { %2005 = vtanh.f32 %v258_v18  ;;  %v1588_v21 = vmul.f32 -1.442695, %v258_v18 }
  0xe3   :  { %v2245_v47 = vpop.f32.mrb[4].mxu0 }
  0xe4   :  { %2007 = vpow2.f32 %v1588_v21  ;;  %v2247_v48 = vpop.f32.mrb[5].mxu0 }
  0xe7   :  { %v2249_v49 = vpop.f32.mrb[6].mxu0 }
  0xe8   :  { %v2251_v50 = vpop.f32.mrb[7].mxu0 }
  0xec   :  { %v2006_v20 = vpop.eup %2005 }
  0xed   :  { %268 = vrot.lane.b32.xlu0 %v2006_v20, %s2097_s13 }
  0xee   :  { %v2008_v22 = vpop.eup %2007 }
  0xef   :  { %v262_v23 = vadd.f32 1.0, %v2008_v22 }
  0xf1   :  { %2009 = vrcp.f32 %v262_v23 }
  0xfb   :  { %v2010_v24 = vpop.eup %2009 }
  0xfc   :  { %v266_v27 = vmul.f32 0.0, %v2010_v24 }
 0x15f   :  { %v269_v25 = vpop.permute.xlu0 %268 }
 0x160   :  { %v271_v26 = vmul.f32 %v2010_v24, %v269_v25 }
 0x162   :  { %273 = vrot.lane.b32.xlu0 %v271_v26, %s2098_s3 }
 0x1d4   :  { %v274_v28 = vpop.permute.xlu0 %273 }
 0x1d5   :  { %v2192_v29 = vadd.f32 %v274_v28, %v266_v27 }
 0x1d7   :  { %2011 = vtanh.f32 %v2192_v29 }
 0x1e1   :  { %v2012_v42 = vpop.eup %2011 }
 0x1e2   :  { %279 = vrot.lane.b32.xlu1 %v2012_v42, %s2097_s13 }
 0x254   :  { %v280_v43 = vpop.permute.xlu1 %279 }
 0x255   :  { %v282_v44 = vmul.f32 %v2010_v24, %v280_v43 }
 0x257   :  { %290 = vrot.lane.b32.xlu1 %v282_v44, %s2098_s3 }
 0x2c9   :  { %v291_v51 = vpop.permute.xlu1 %290 }
 0x2ca   :  { %1738 = vmatmul.mubr.msk.f32.vlgmr.msra.gmra.mrb[2].mxu1 %vm184_vm5, %v291_v51  ;;  %1749 = vmatmul.mubr.msk.f32.vlgmr.msra.gmra.mrb[8].mxu0 %vm184_vm5, %v291_v51 }
 0x2cb   :  { %1920 = vmatpush3.bf16.msra.mxu1 %v2212_v35  ;;  %1926 = vmatpush3.bf16.msra.mxu0 %v2150_v6 }
 0x2cc   :  { %1921 = vmatprep.subr.bf16.mxu1 %v2093_v2  ;;  %1927 = vmatprep.subr.bf16.mxu0 %v2093_v2 }
 0x2cd   :  { %1770 = vmatprep.mubr.msk.f32.mxu0 %vm2095_vm4, %v2096_v9  ;;  %1759 = vmatprep.mubr.msk.f32.mxu1 %vm2095_vm4, %v2096_v9 }
 0x2cf   :  { %1923 = vmatpush3.bf16.msra.mxu1 %v2228_v40  ;;  %1929 = vmatpush3.bf16.msra.mxu0 %v2168_v12 }
 0x2d0   :  { %1930 = vmatprep.subr.bf16.mxu1 %v2093_v2  ;;  %1936 = vmatprep.subr.bf16.mxu0 %v2093_v2 }
 0x39d   :  { %v360_v54 = vpop.f32.mrb[2].mxu1  ;;  %v431_v55 = vpop.f32.mrb[8].mxu0 }
 0x39e   :  { %v361_v56 = vadd.f32 %v2270_v52, %v360_v54  ;;  %v435_v57 = vadd.f32 %v431_v55, %v142_v53  ;;  %v1739_v58 = vpop.f32.mrb[3].mxu1  ;;  %v1750_v59 = vpop.f32.mrb[9].mxu0 }
 0x3a0   :  { %364 = vst [vmem:[#allocation2] sm:$0xff] %v361_v56  ;;  %2013 = vtanh.f32 %v435_v57  ;;  %v1592_v61 = vmul.f32 -1.442695, %v435_v57 }
 0x3a2   :  { %2015 = vpow2.f32 %v1592_v61 }
 0x3aa   :  { %v2014_v60 = vpop.eup %2013 }
 0x3ab   :  { %445 = vrot.lane.b32.xlu0 %v2014_v60, %s2097_s13 }
 0x3ac   :  { %v2016_v62 = vpop.eup %2015 }
 0x3ad   :  { %v439_v63 = vadd.f32 1.0, %v2016_v62 }
 0x3af   :  { %2017 = vrcp.f32 %v439_v63 }
 0x3b9   :  { %v2018_v0 = vpop.eup %2017 }
 0x3ba   :  { %v443_v4 = vmul.f32 %v2018_v0, %v2192_v29 }
 0x41d   :  { %v446_v1 = vpop.permute.xlu0 %445 }
 0x41e   :  { %v448_v3 = vmul.f32 %v2018_v0, %v446_v1 }
 0x420   :  { %450 = vrot.lane.b32.xlu1 %v448_v3, %s2098_s3 }
 0x492   :  { %v451_v5 = vpop.permute.xlu1 %450 }
 0x493   :  { %v453_v7 = vadd.f32 %v451_v5, %v443_v4 }
 0x495   :  { %2019 = vtanh.f32 %v453_v7 }
 0x49f   :  { %v2020_v8 = vpop.eup %2019 }
 0x4a0   :  { %456 = vrot.lane.b32.xlu0 %v2020_v8, %s2097_s13 }
 0x512   :  { %v457_v10 = vpop.permute.xlu0 %456 }
 0x513   :  { %v459_v11 = vmul.f32 %v2018_v0, %v457_v10  ;;  %v157_v0 = vadd.f32 %v2185_v13, %v2247_v48 }
 0x515   :  { %461 = vrot.lane.b32.xlu1 %v459_v11, %s2098_s3 }
 0x587   :  { %v462_v14 = vpop.permute.xlu1 %461 }
 0x588   :  { %1760 = vmatmul.mubr.msk.f32.vlgmr.msra.gmra.mrb[4].mxu1 %vm184_vm5, %v462_v14  ;;  %1771 = vmatmul.mubr.msk.f32.vlgmr.msra.gmra.mrb[10].mxu0 %vm184_vm5, %v462_v14 }
 0x589   :  { %1932 = vmatpush3.bf16.msra.mxu1 %v2212_v35  ;;  %1938 = vmatpush3.bf16.msra.mxu0 %v2150_v6 }
 0x58a   :  { %1933 = vmatprep.subr.bf16.mxu1 %v2093_v2  ;;  %1939 = vmatprep.subr.bf16.mxu0 %v2093_v2 }
 0x58b   :  { %1792 = vmatprep.mubr.msk.f32.mxu0 %vm2095_vm4, %v2096_v9  ;;  %1781 = vmatprep.mubr.msk.f32.mxu1 %vm2095_vm4, %v2096_v9 }
 0x58d   :  { %1935 = vmatpush3.bf16.msra.mxu1 %v2228_v40  ;;  %1941 = vmatpush3.bf16.msra.mxu0 %v2168_v12 }
 0x58e   :  { %1942 = vmatprep.subr.bf16.mxu1 %v2093_v2  ;;  %1948 = vmatprep.subr.bf16.mxu0 %v2093_v2 }
 0x65b   :  { %v531_v16 = vpop.f32.mrb[4].mxu1  ;;  %v602_v17 = vpop.f32.mrb[10].mxu0 }
 0x65c   :  { %v532_v18 = vadd.f32 %v2270_v52, %v531_v16  ;;  %v606_v19 = vadd.f32 %v602_v17, %v147_v15  ;;  %v1761_v20 = vpop.f32.mrb[5].mxu1  ;;  %v1772_v21 = vpop.f32.mrb[11].mxu0 }
 0x65e   :  { %535 = vst [vmem:[#allocation2 + $0x8] sm:$0xff] %v532_v18  ;;  %2021 = vtanh.f32 %v606_v19  ;;  %v1595_v23 = vmul.f32 -1.442695, %v606_v19 }
 0x660   :  { %2023 = vpow2.f32 %v1595_v23 }
 0x668   :  { %v2022_v22 = vpop.eup %2021 }
 0x669   :  { %616 = vrot.lane.b32.xlu0 %v2022_v22, %s2097_s13 }
 0x66a   :  { %v2024_v24 = vpop.eup %2023 }
 0x66b   :  { %v610_v25 = vadd.f32 1.0, %v2024_v24 }
 0x66d   :  { %2025 = vrcp.f32 %v610_v25  ;;  %v162_v25 = vadd.f32 %v2245_v47, %v2185_v13 }
 0x677   :  { %v2026_v26 = vpop.eup %2025 }
 0x678   :  { %v614_v29 = vmul.f32 %v2026_v26, %v453_v7 }
 0x6db   :  { %v617_v27 = vpop.permute.xlu0 %616 }
 0x6dc   :  { %v619_v28 = vmul.f32 %v2026_v26, %v617_v27 }
 0x6de   :  { %621 = vrot.lane.b32.xlu1 %v619_v28, %s2098_s3 }
 0x750   :  { %v622_v30 = vpop.permute.xlu1 %621 }
 0x751   :  { %v624_v31 = vadd.f32 %v622_v30, %v614_v29 }
 0x753   :  { %2027 = vtanh.f32 %v624_v31 }
 0x75d   :  { %v2028_v32 = vpop.eup %2027 }
 0x75e   :  { %627 = vrot.lane.b32.xlu0 %v2028_v32, %s2097_s13 }
 0x7d0   :  { %v628_v33 = vpop.permute.xlu0 %627 }
 0x7d1   :  { %v630_v34 = vmul.f32 %v2026_v26, %v628_v33 }
 0x7d3   :  { %632 = vrot.lane.b32.xlu1 %v630_v34, %s2098_s3 }
 0x845   :  { %v633_v36 = vpop.permute.xlu1 %632 }
 0x846   :  { %1782 = vmatmul.mubr.msk.f32.vlgmr.msra.gmra.mrb[6].mxu1 %vm184_vm5, %v633_v36  ;;  %1793 = vmatmul.mubr.msk.f32.vlgmr.msra.gmra.mrb[12].mxu0 %vm184_vm5, %v633_v36 }
 0x847   :  { %1944 = vmatpush3.bf16.msra.mxu1 %v2212_v35  ;;  %1950 = vmatpush3.bf16.msra.mxu0 %v2150_v6 }
 0x848   :  { %1945 = vmatprep.subr.bf16.mxu1 %v2093_v2  ;;  %1951 = vmatprep.subr.bf16.mxu0 %v2093_v2 }
 0x849   :  { %1814 = vmatprep.mubr.msk.f32.mxu0 %vm2095_vm4, %v2096_v9  ;;  %1803 = vmatprep.mubr.msk.f32.mxu1 %vm2095_vm4, %v2096_v9 }
 0x84b   :  { %1947 = vmatpush3.bf16.msra.mxu1 %v2228_v40  ;;  %1953 = vmatpush3.bf16.msra.mxu0 %v2168_v12 }
 0x84c   :  { %1954 = vmatprep.subr.bf16.mxu1 %v2093_v2  ;;  %1960 = vmatprep.subr.bf16.mxu0 %v2093_v2 }
 0x919   :  { %v702_v38 = vpop.f32.mrb[6].mxu1  ;;  %v773_v39 = vpop.f32.mrb[12].mxu0 }
 0x91a   :  { %v703_v41 = vadd.f32 %v2270_v52, %v702_v38  ;;  %v777_v42 = vadd.f32 %v773_v39, %v152_v37  ;;  %v1783_v43 = vpop.f32.mrb[7].mxu1  ;;  %v1794_v44 = vpop.f32.mrb[13].mxu0 }
 0x91c   :  { %706 = vst [vmem:[#allocation2 + $0x10] sm:$0xff] %v703_v41  ;;  %2029 = vtanh.f32 %v777_v42  ;;  %v1598_v51 = vmul.f32 -1.442695, %v777_v42 }
 0x91e   :  { %2031 = vpow2.f32 %v1598_v51 }
 0x926   :  { %v2030_v46 = vpop.eup %2029 }
 0x927   :  { %787 = vrot.lane.b32.xlu0 %v2030_v46, %s2097_s13 }
 0x928   :  { %v2032_v53 = vpop.eup %2031 }
 0x929   :  { %v781_v54 = vadd.f32 1.0, %v2032_v53  ;;  %v167_v53 = vadd.f32 %v2185_v13, %v2251_v50 }
 0x92b   :  { %2033 = vrcp.f32 %v781_v54 }
 0x935   :  { %v2034_v55 = vpop.eup %2033 }
 0x936   :  { %v785_v57 = vmul.f32 %v2034_v55, %v624_v31 }
 0x999   :  { %v788_v56 = vpop.permute.xlu0 %787 }
 0x99a   :  { %v790_v45 = vmul.f32 %v2034_v55, %v788_v56 }
 0x99c   :  { %792 = vrot.lane.b32.xlu1 %v790_v45, %s2098_s3 }
 0xa0e   :  { %v793_v58 = vpop.permute.xlu1 %792 }
 0xa0f   :  { %v795_v59 = vadd.f32 %v793_v58, %v785_v57 }
 0xa11   :  { %2035 = vtanh.f32 %v795_v59 }
 0xa1b   :  { %v2036_v60 = vpop.eup %2035 }
 0xa1c   :  { %798 = vrot.lane.b32.xlu0 %v2036_v60, %s2097_s13 }
 0xa8e   :  { %v799_v61 = vpop.permute.xlu0 %798 }
 0xa8f   :  { %v801_v62 = vmul.f32 %v2034_v55, %v799_v61 }
 0xa91   :  { %803 = vrot.lane.b32.xlu1 %v801_v62, %s2098_s3 }
 0xb03   :  { %v804_v63 = vpop.permute.xlu1 %803 }
 0xb04   :  { %1804 = vmatmul.mubr.msk.f32.vlgmr.msra.gmra.mrb[8].mxu1 %vm184_vm5, %v804_v63  ;;  %1815 = vmatmul.mubr.msk.f32.vlgmr.msra.gmra.mrb[14].mxu0 %vm184_vm5, %v804_v63 }
 0xb05   :  { %1956 = vmatpush3.bf16.msra.mxu1 %v2212_v35  ;;  %1962 = vmatpush3.bf16.msra.mxu0 %v2150_v6 }
 0xb06   :  { %1957 = vmatprep.subr.bf16.mxu1 %v2093_v2  ;;  %1963 = vmatprep.subr.bf16.mxu0 %v2093_v2 }
 0xb07   :  { %1836 = vmatprep.mubr.msk.f32.mxu0 %vm2095_vm4, %v2096_v9  ;;  %1825 = vmatprep.mubr.msk.f32.mxu1 %vm2095_vm4, %v2096_v9 }
 0xb09   :  { %1959 = vmatpush3.bf16.msra.mxu1 %v2228_v40  ;;  %1965 = vmatpush3.bf16.msra.mxu0 %v2168_v12 }
 0xb0a   :  { %1966 = vmatprep.subr.bf16.mxu1 %v2093_v2  ;;  %1972 = vmatprep.subr.bf16.mxu0 %v2093_v2 }
 0xbd7   :  { %v873_v1 = vpop.f32.mrb[8].mxu1  ;;  %v944_v3 = vpop.f32.mrb[14].mxu0 }
 0xbd8   :  { %v874_v4 = vadd.f32 %v2270_v52, %v873_v1  ;;  %v948_v5 = vadd.f32 %v944_v3, %v157_v0  ;;  %v1805_v7 = vpop.f32.mrb[9].mxu1  ;;  %v1816_v8 = vpop.f32.mrb[15].mxu0 }
 0xbd9   :  { %v172_v8 = vadd.f32 %v2249_v49, %v2185_v13 }
 0xbda   :  { %877 = vst [vmem:[#allocation2 + $0x18] sm:$0xff] %v874_v4  ;;  %2037 = vtanh.f32 %v948_v5  ;;  %v1601_v11 = vmul.f32 -1.442695, %v948_v5 }
 0xbdc   :  { %2039 = vpow2.f32 %v1601_v11 }
 0xbe4   :  { %v2038_v10 = vpop.eup %2037 }
 0xbe5   :  { %958 = vrot.lane.b32.xlu0 %v2038_v10, %s2097_s13 }
 0xbe6   :  { %v2040_v14 = vpop.eup %2039 }
 0xbe7   :  { %v952_v15 = vadd.f32 1.0, %v2040_v14 }
 0xbe9   :  { %2041 = vrcp.f32 %v952_v15 }
 0xbf3   :  { %v2042_v16 = vpop.eup %2041 }
 0xbf4   :  { %v956_v18 = vmul.f32 %v2042_v16, %v795_v59 }
 0xc57   :  { %v959_v17 = vpop.permute.xlu0 %958 }
 0xc58   :  { %v961_v48 = vmul.f32 %v2042_v16, %v959_v17 }
 0xc5a   :  { %963 = vrot.lane.b32.xlu1 %v961_v48, %s2098_s3 }
 0xccc   :  { %v964_v19 = vpop.permute.xlu1 %963 }
 0xccd   :  { %v966_v20 = vadd.f32 %v964_v19, %v956_v18 }
 0xccf   :  { %2043 = vtanh.f32 %v966_v20 }
 0xcd9   :  { %v2044_v21 = vpop.eup %2043 }
 0xcda   :  { %969 = vrot.lane.b32.xlu0 %v2044_v21, %s2097_s13 }
 0xd4c   :  { %v970_v22 = vpop.permute.xlu0 %969 }
 0xd4d   :  { %v972_v23 = vmul.f32 %v2042_v16, %v970_v22 }
 0xd4f   :  { %974 = vrot.lane.b32.xlu1 %v972_v23, %s2098_s3 }
 0xdc1   :  { %v975_v24 = vpop.permute.xlu1 %974 }
 0xdc2   :  { %1826 = vmatmul.mubr.msk.f32.vlgmr.msra.gmra.mrb[10].mxu1 %vm184_vm5, %v975_v24  ;;  %1837 = vmatmul.mubr.msk.f32.vlgmr.msra.gmra.mrb[16].mxu0 %vm184_vm5, %v975_v24 }
 0xdc3   :  { %1968 = vmatpush3.bf16.msra.mxu1 %v2212_v35  ;;  %1974 = vmatpush3.bf16.msra.mxu0 %v2150_v6 }
 0xdc4   :  { %1969 = vmatprep.subr.bf16.mxu1 %v2093_v2  ;;  %1975 = vmatprep.subr.bf16.mxu0 %v2093_v2 }
 0xdc5   :  { %1858 = vmatprep.mubr.msk.f32.mxu0 %vm2095_vm4, %v2096_v9  ;;  %1847 = vmatprep.mubr.msk.f32.mxu1 %vm2095_vm4, %v2096_v9 }
 0xdc7   :  { %1971 = vmatpush3.bf16.msra.mxu1 %v2228_v40  ;;  %1977 = vmatpush3.bf16.msra.mxu0 %v2168_v12 }
 0xdc8   :  { %1978 = vmatprep.subr.bf16.mxu1 %v2093_v2  ;;  %1984 = vmatprep.subr.bf16.mxu0 %v2093_v2 }
 0xe95   :  { %v1044_v26 = vpop.f32.mrb[10].mxu1  ;;  %v1115_v27 = vpop.f32.mrb[16].mxu0 }
 0xe96   :  { %v1045_v28 = vadd.f32 %v2270_v52, %v1044_v26  ;;  %v1119_v29 = vadd.f32 %v1115_v27, %v162_v25  ;;  %v1827_v30 = vpop.f32.mrb[11].mxu1  ;;  %v1838_v31 = vpop.f32.mrb[17].mxu0 }
 0xe98   :  { %1048 = vst [vmem:[#allocation2 + $0x20] sm:$0xff] %v1045_v28  ;;  %2045 = vtanh.f32 %v1119_v29  ;;  %v1604_v33 = vmul.f32 -1.442695, %v1119_v29 }
 0xe9a   :  { %2047 = vpow2.f32 %v1604_v33 }
 0xea2   :  { %v2046_v32 = vpop.eup %2045 }
 0xea3   :  { %1129 = vrot.lane.b32.xlu0 %v2046_v32, %s2097_s13 }
 0xea4   :  { %v2048_v34 = vpop.eup %2047 }
 0xea5   :  { %v1123_v36 = vadd.f32 1.0, %v2048_v34 }
 0xea7   :  { %2049 = vrcp.f32 %v1123_v36 }
 0xeb1   :  { %v2050_v37 = vpop.eup %2049 }
 0xeb2   :  { %v1127_v39 = vmul.f32 %v2050_v37, %v966_v20 }
 0xf15   :  { %v1130_v38 = vpop.permute.xlu0 %1129 }
 0xf16   :  { %v1132_v47 = vmul.f32 %v2050_v37, %v1130_v38 }
 0xf18   :  { %1134 = vrot.lane.b32.xlu1 %v1132_v47, %s2098_s3 }
 0xf8a   :  { %v1135_v41 = vpop.permute.xlu1 %1134 }
 0xf8b   :  { %v1137_v42 = vadd.f32 %v1135_v41, %v1127_v39 }
 0xf8d   :  { %2051 = vtanh.f32 %v1137_v42 }
 0xf97   :  { %v2052_v43 = vpop.eup %2051 }
 0xf98   :  { %1140 = vrot.lane.b32.xlu0 %v2052_v43, %s2097_s13 }
0x100a   :  { %v1141_v44 = vpop.permute.xlu0 %1140 }
0x100b   :  { %v1143_v46 = vmul.f32 %v2050_v37, %v1141_v44 }
0x100d   :  { %1145 = vrot.lane.b32.xlu1 %v1143_v46, %s2098_s3 }
0x107f   :  { %v1146_v51 = vpop.permute.xlu1 %1145 }
0x1080   :  { %1848 = vmatmul.mubr.msk.f32.vlgmr.msra.gmra.mrb[12].mxu1 %vm184_vm5, %v1146_v51  ;;  %1859 = vmatmul.mubr.msk.f32.vlgmr.msra.gmra.mrb[18].mxu0 %vm184_vm5, %v1146_v51 }
0x1081   :  { %1980 = vmatpush3.bf16.msra.mxu1 %v2212_v35  ;;  %1986 = vmatpush3.bf16.msra.mxu0 %v2150_v6 }
0x1082   :  { %1981 = vmatprep.subr.bf16.mxu1 %v2093_v2  ;;  %1987 = vmatprep.subr.bf16.mxu0 %v2093_v2 }
0x1083   :  { %1880 = vmatprep.mubr.msk.f32.mxu0 %vm2095_vm4, %v2096_v9  ;;  %1869 = vmatprep.mubr.msk.f32.mxu1 %vm2095_vm4, %v2096_v9 }
0x1085   :  { %1983 = vmatpush3.bf16.msra.mxu1 %v2228_v40  ;;  %1989 = vmatpush3.bf16.msra.mxu0 %v2168_v12 }
0x1086   :  { %1990 = vmatprep.subr.bf16.mxu1 %v2093_v2 }
0x1153   :  { %v1215_v6 = vpop.f32.mrb[12].mxu1  ;;  %v1286_v54 = vpop.f32.mrb[18].mxu0 }
0x1154   :  { %v1216_v55 = vadd.f32 %v2270_v52, %v1215_v6  ;;  %v1290_v56 = vadd.f32 %v1286_v54, %v167_v53  ;;  %v1849_v45 = vpop.f32.mrb[13].mxu1  ;;  %v1860_v57 = vpop.f32.mrb[19].mxu0 }
0x1156   :  { %1219 = vst [vmem:[#allocation2 + $0x28] sm:$0xff] %v1216_v55  ;;  %2053 = vtanh.f32 %v1290_v56  ;;  %v1607_v59 = vmul.f32 -1.442695, %v1290_v56 }
0x1158   :  { %2055 = vpow2.f32 %v1607_v59 }
0x1160   :  { %v2054_v58 = vpop.eup %2053 }
0x1161   :  { %1300 = vrot.lane.b32.xlu0 %v2054_v58, %s2097_s13 }
0x1162   :  { %v2056_v12 = vpop.eup %2055 }
0x1163   :  { %v1294_v60 = vadd.f32 1.0, %v2056_v12 }
0x1165   :  { %2057 = vrcp.f32 %v1294_v60 }
0x116f   :  { %v2058_v61 = vpop.eup %2057 }
0x1170   :  { %v1298_v63 = vmul.f32 %v2058_v61, %v1137_v42 }
0x11d3   :  { %v1301_v62 = vpop.permute.xlu0 %1300 }
0x11d4   :  { %v1303_v50 = vmul.f32 %v2058_v61, %v1301_v62 }
0x11d6   :  { %1305 = vrot.lane.b32.xlu1 %v1303_v50, %s2098_s3 }
0x1248   :  { %v1306_v0 = vpop.permute.xlu1 %1305 }
0x1249   :  { %v1308_v1 = vadd.f32 %v1306_v0, %v1298_v63 }
0x124b   :  { %2059 = vtanh.f32 %v1308_v1 }
0x1255   :  { %v2060_v3 = vpop.eup %2059 }
0x1256   :  { %1311 = vrot.lane.b32.xlu0 %v2060_v3, %s2097_s13 }
0x12c8   :  { %v1312_v4 = vpop.permute.xlu0 %1311 }
0x12c9   :  { %v1314_v5 = vmul.f32 %v2058_v61, %v1312_v4 }
0x12cb   :  { %1316 = vrot.lane.b32.xlu1 %v1314_v5, %s2098_s3 }
0x133d   :  { %v1317_v7 = vpop.permute.xlu1 %1316 }
0x133e   :  { %1870 = vmatmul.mubr.msk.f32.vlgmr.msra.gmra.mrb[14].mxu1 %vm184_vm5, %v1317_v7  ;;  %1881 = vmatmul.mubr.msk.f32.vlgmr.msra.gmra.mrb[20].mxu0 %vm184_vm5, %v1317_v7 }
0x133f   :  { %1992 = vmatpush3.bf16.msra.mxu1 %v2212_v35  ;;  %1891 = vmatprep.mubr.msk.f32.mxu1 %vm2095_vm4, %v2096_v9 }
0x1340   :  { %1993 = vmatprep.subr.bf16.mxu1 %v2093_v2 }
0x1343   :  { %1995 = vmatpush3.bf16.msra.mxu1 %v2228_v40 }
0x1411   :  { %v1386_v10 = vpop.f32.mrb[14].mxu1  ;;  %v1457_v11 = vpop.f32.mrb[20].mxu0 }
0x1412   :  { %v1387_v14 = vadd.f32 %v2270_v52, %v1386_v10  ;;  %v1461_v15 = vadd.f32 %v1457_v11, %v172_v8  ;;  %v1871_v16 = vpop.f32.mrb[15].mxu1  ;;  %v1882_v17 = vpop.f32.mrb[21].mxu0 }
0x1414   :  { %1390 = vst [vmem:[#allocation2 + $0x30] sm:$0xff] %v1387_v14  ;;  %2061 = vtanh.f32 %v1461_v15  ;;  %v1610_v9 = vmul.f32 -1.442695, %v1461_v15 }
0x1416   :  { %2063 = vpow2.f32 %v1610_v9 }
0x141e   :  { %v2062_v35 = vpop.eup %2061 }
0x141f   :  { %1471 = vrot.lane.b32.xlu0 %v2062_v35, %s2097_s13 }
0x1420   :  { %v2064_v2 = vpop.eup %2063 }
0x1421   :  { %v1465_v48 = vadd.f32 1.0, %v2064_v2 }
0x1423   :  { %2065 = vrcp.f32 %v1465_v48 }
0x142d   :  { %v2066_v40 = vpop.eup %2065 }
0x142e   :  { %v1469_v49 = vmul.f32 %v2066_v40, %v1308_v1 }
0x1491   :  { %v1472_v18 = vpop.permute.xlu0 %1471 }
0x1492   :  { %v1474_v13 = vmul.f32 %v2066_v40, %v1472_v18 }
0x1494   :  { %1476 = vrot.lane.b32.xlu1 %v1474_v13, %s2098_s3 }
0x1506   :  { %v1477_v19 = vpop.permute.xlu1 %1476 }
0x1507   :  { %v1479_v20 = vadd.f32 %v1477_v19, %v1469_v49 }
0x1509   :  { %2067 = vtanh.f32 %v1479_v20 }
0x1513   :  { %v2068_v21 = vpop.eup %2067 }
0x1514   :  { %1482 = vrot.lane.b32.xlu0 %v2068_v21, %s2097_s13 }
0x1586   :  { %v1483_v22 = vpop.permute.xlu0 %1482 }
0x1587   :  { %v1485_v23 = vmul.f32 %v2066_v40, %v1483_v22 }
0x1589   :  { %1487 = vrot.lane.b32.xlu1 %v1485_v23, %s2098_s3 }
0x15fb   :  { %v1488_v24 = vpop.permute.xlu1 %1487 }
0x15fc   :  { %1892 = vmatmul.mubr.msk.f32.vlgmr.msra.gmra.mrb[16].mxu1 %vm184_vm5, %v1488_v24 }
0x16cf   :  { %v1557_v25 = vpop.f32.mrb[16].mxu1 }
0x16d0   :  { %v1558_v26 = vadd.f32 %v2270_v52, %v1557_v25  ;;  %v1893_v27 = vpop.f32.mrb[17].mxu1 }
0x16d2   :  { %1561 = vst [vmem:[#allocation2 + $0x38] sm:$0xff] %v1558_v26 }
0x16d3   :  { %2080 = shalt.err (!%p2077_p4)
}
0x16d4   :  { %s2081_s12 = scalar_lea.hbm %s2417_s6, 1024 }
0x16d5   :  { %p2082_p5 = scmp.ne.s32.totalorder %s2417_s6, %s2081_s12  ;;  %p2085_p6 = scmp.lt.u32.totalorder %s2081_s12, %s2417_s6 }
0x16d7   :  { %p2087_p7 = pnand %p2085_p6, %p2082_p5 }
0x16d9   :  { %2090 = shalt.err (!%p2087_p7)
}
0x16da   :  { %s2100_s16 = smov 128   ;;  %s2101_s17 = smov 8  }
0x16db   :  { %1573 = dma.vmem_to_hbm [thread:$0]  %s1568_s9, 1024, %s2417_s6, [#allocation3], %s2100_s16, %s2100_s16, %s2101_s17  }
0x16dc   :  { %2091 = dma.done.wait [#allocation3], 1024  }
0x16dd   :  { %2092 = vsyncadd [#allocation3], 4294966272 }
0x16de   :  { %1577 = vsyncpa [#allocation3], 1 }

</bundles_post_ra>
